<compile_context>
chip_gen: v5e
topology: v5e:2x2
jax: 0.10.0
libtpu: 0.0.40
codegen_flags: <defaults>
</compile_context>

<pallas_src>
import functools

import jax
import jax.numpy as jnp
from jax import lax
from jax.experimental import pallas as pl
from jax.experimental.pallas import tpu as pltpu


def _generator_kernel(x_ref, w1_ref, b1_ref, w2_ref, b2_ref, w3_ref, b3_ref,
                      o_ref, *, compute_dtype, relu_in_compute_dtype):
    cd = compute_dtype
    # x_ref: (batch_tile, latent) f32, row-major block straight from the caller.
    x = x_ref[...].astype(cd)

    # fc1 + relu -> (hidden, batch_tile); contract the last dim of both
    # operands (w1 is (hidden, latent)), i.e. w1 @ x.T without a wrapper-side
    # transpose.  f32 accumulation on the MXU.
    h = lax.dot_general(w1_ref[...], x, (((1,), (1,)), ((), ())),
                        preferred_element_type=jnp.float32)
    h = h + b1_ref[...]
    if relu_in_compute_dtype:
        h = h.astype(cd)
    h = jnp.maximum(h, 0.0).astype(cd)

    # fc2 + relu (activations stay feature-major, batch on lanes).
    h = jnp.dot(w2_ref[...], h, preferred_element_type=jnp.float32) + b2_ref[...]
    if relu_in_compute_dtype:
        h = h.astype(cd)
    h = jnp.maximum(h, 0.0).astype(cd)

    # fout (no activation) -> (3, batch_tile), lane-dense store.
    out = jnp.dot(w3_ref[...], h, preferred_element_type=jnp.float32) + b3_ref[...]
    o_ref[...] = out.astype(o_ref.dtype)


def _default_min_grid():
    # v7x has two TensorCores; feed both via the "parallel" batch axis.
    try:
        kind = jax.devices()[0].device_kind.lower()
    except Exception:
        return 2
    return 4 if "v7" in kind else 2


def _choose_tiling(B, *, cap=8192, min_grid=2):
    """Pick a 128-aligned batch tile and a (possibly padded) batch size.

    Prefers the largest tile <= cap that divides B with grid >= min_grid;
    otherwise pads the batch up (padding is sliced off after the kernel).
    """
    cap = max(128, (cap // 128) * 128)
    max_tile = min(cap, (B // min_grid // 128) * 128)
    for tile in range(max_tile, 0, -128):
        if B % tile == 0:
            return tile, B
    # No exact fit: pad the batch so the grid has at least min_grid steps.
    tile = min(cap, max(128, ((pl.cdiv(B, min_grid) + 127) // 128) * 128))
    b_pad = max(pl.cdiv(B, tile), min_grid) * tile
    return tile, b_pad


def generator_forward(x, params, *, batch_tile=None, batch_tile_cap=8192,
                      min_grid=None, compute_dtype=jnp.bfloat16,
                      relu_in_compute_dtype=True, out_dtype=jnp.float32,
                      feature_major_output=False):
    """x: (B, sz_latent) float32; params in PyTorch (out, in) layout.

    Returns (B, 3) `out_dtype` (or (3, B) feature-major if requested, which
    avoids the final XLA transpose entirely).
    """
    B, sz_latent = x.shape
    w1, b1 = params["w1"], params["b1"]   # (hidden, latent), (hidden, 1)
    w2, b2 = params["w2"], params["b2"]   # (hidden, hidden), (hidden, 1)
    w3, b3 = params["w3"], params["b3"]   # (3, hidden),      (3, 1)
    sz_hidden = w1.shape[0]
    sz_out = w3.shape[0]

    if min_grid is None:
        min_grid = _default_min_grid()
    if batch_tile is None:
        batch_tile, b_pad = _choose_tiling(B, cap=batch_tile_cap, min_grid=min_grid)
    else:
        assert batch_tile % 128 == 0, "batch_tile must be a multiple of 128"
        b_pad = pl.cdiv(B, batch_tile) * batch_tile

    x_f32 = jnp.asarray(x, jnp.float32)
    if b_pad != B:
        x_f32 = jnp.pad(x_f32, ((0, b_pad - B), (0, 0)))

    grid = (b_pad // batch_tile,)

    w1c = w1.astype(compute_dtype)
    w2c = w2.astype(compute_dtype)
    w3c = w3.astype(compute_dtype)
    b1f = jnp.asarray(b1, jnp.float32).reshape(sz_hidden, 1)
    b2f = jnp.asarray(b2, jnp.float32).reshape(sz_hidden, 1)
    b3f = jnp.asarray(b3, jnp.float32).reshape(sz_out, 1)

    w_item = jnp.dtype(compute_dtype).itemsize
    out_item = jnp.dtype(out_dtype).itemsize
    flops = 2 * b_pad * (sz_latent * sz_hidden + sz_hidden * sz_hidden
                         + sz_hidden * sz_out)
    bytes_accessed = (
        b_pad * sz_latent * 4                              # x stream (f32)
        + b_pad * sz_out * out_item                        # output stream
        + (sz_latent * sz_hidden + sz_hidden * sz_hidden
           + sz_hidden * sz_out) * w_item                  # weights
        + (2 * sz_hidden + sz_out) * 4                     # biases
    )

    kernel = functools.partial(_generator_kernel,
                               compute_dtype=compute_dtype,
                               relu_in_compute_dtype=relu_in_compute_dtype)

    full = lambda shape: pl.BlockSpec(shape, lambda i: (0, 0))

    out_fm = pl.pallas_call(
        kernel,
        out_shape=jax.ShapeDtypeStruct((sz_out, b_pad), out_dtype),
        grid_spec=pltpu.PrefetchScalarGridSpec(
            num_scalar_prefetch=0,
            grid=grid,
            in_specs=[
                pl.BlockSpec((batch_tile, sz_latent), lambda i: (i, 0)),  # x tile
                full((sz_hidden, sz_latent)),                             # w1
                full((sz_hidden, 1)),                                     # b1
                full((sz_hidden, sz_hidden)),                             # w2
                full((sz_hidden, 1)),                                     # b2
                full((sz_out, sz_hidden)),                                # w3
                full((sz_out, 1)),                                        # b3
            ],
            out_specs=pl.BlockSpec((sz_out, batch_tile), lambda i: (0, i)),
        ),
        compiler_params=pltpu.CompilerParams(
            dimension_semantics=("parallel",),
            vmem_limit_bytes=32 * 1024 * 1024,
        ),
        cost_estimate=pl.CostEstimate(
            flops=flops, transcendentals=0, bytes_accessed=bytes_accessed),
    )(x_f32, w1c, b1f, w2c, b2f, w3c, b3f)

    out_fm = out_fm[:, :B]
    if feature_major_output:
        return out_fm        # (3, B) -- consumers that can adapt skip the transpose
    return out_fm.T          # (B, 3), transpose stays in XLA (tiny output)


def init_generator_params(key, sz_latent, sz_hidden, sz_out=3):
    """PyTorch nn.Linear default init: U[-1/sqrt(fan_in), 1/sqrt(fan_in)].
    Weights stored in PyTorch layout (out_features, in_features)."""
    def linear(key, fan_in, fan_out):
        kw, kb = jax.random.split(key)
        bound = 1.0 / jnp.sqrt(float(fan_in))
        w = jax.random.uniform(kw, (fan_out, fan_in), jnp.float32, -bound, bound)
        b = jax.random.uniform(kb, (fan_out, 1), jnp.float32, -bound, bound)
        return w, b

    k1, k2, k3 = jax.random.split(key, 3)
    w1, b1 = linear(k1, sz_latent, sz_hidden)
    w2, b2 = linear(k2, sz_hidden, sz_hidden)
    w3, b3 = linear(k3, sz_hidden, sz_out)
    return {"w1": w1, "b1": b1, "w2": w2, "b2": b2, "w3": w3, "b3": b3}


def generator_ref(x, params, compute_dtype=jnp.bfloat16, relu_in_compute_dtype=True):
    """Pure-JAX reference mirroring the kernel's cast points (f32 math)."""
    cd = compute_dtype
    f32 = jnp.float32
    c = lambda a: a.astype(cd).astype(f32)

    xT = c(jnp.asarray(x, f32)).T
    w1, w2, w3 = c(params["w1"]), c(params["w2"]), c(params["w3"])
    b1 = jnp.asarray(params["b1"], f32).reshape(-1, 1)
    b2 = jnp.asarray(params["b2"], f32).reshape(-1, 1)
    b3 = jnp.asarray(params["b3"], f32).reshape(-1, 1)

    def act(h):
        if relu_in_compute_dtype:
            h = c(h)
        return c(jnp.maximum(h, 0.0))

    h1 = act(w1 @ xT + b1)
    h2 = act(w2 @ h1 + b2)
    out = w3 @ h2 + b3
    return out.T


if __name__ == "__main__":
    sz_latent = 16
    sz_hidden = 32
    batch = 512   # small demo batch; tiling still exercises grid >= 2 (>= 4 on v7x)

    key = jax.random.PRNGKey(0)
    kx, kp = jax.random.split(key)

    x = jax.random.normal(kx, (batch, sz_latent), dtype=jnp.float32)
    params = init_generator_params(kp, sz_latent, sz_hidden)

    out = generator_forward(x, params)
    out = jax.block_until_ready(out)

    ref = generator_ref(x, params)
    assert out.shape == (batch, 3), out.shape
    max_err = float(jnp.max(jnp.abs(out - ref)))
    assert jnp.allclose(out, ref, atol=2e-3, rtol=2e-3), \
        f"mismatch vs reference (max abs err {max_err})"

    print("KERNEL_OK")
</pallas_src>

<mosaic_0001>
module attributes {stable_mosaic.version = 11 : i64} {
  func.func @_generator_kernel(%arg0: i32, %arg1: memref<256x16xf32, #tpu.memory_space<vmem>>, %arg2: memref<32x16xbf16, #tpu.memory_space<vmem>>, %arg3: memref<32x1xf32, #tpu.memory_space<vmem>>, %arg4: memref<32x32xbf16, #tpu.memory_space<vmem>>, %arg5: memref<32x1xf32, #tpu.memory_space<vmem>>, %arg6: memref<3x32xbf16, #tpu.memory_space<vmem>>, %arg7: memref<3x1xf32, #tpu.memory_space<vmem>>, %arg8: memref<3x256xf32, #tpu.memory_space<vmem>>) attributes {dimension_semantics = [#tpu.dimension_semantics<parallel>], iteration_bounds = array<i64: 2>, scalar_prefetch = 0 : i64, scratch_operands = 0 : i64, tpu.core_type = #tpu.core_type<tc>, window_params = [{transform_indices = @transform_0, window_bounds = array<i64: 256, 16>}, {pipeline_mode = #tpu.pipeline_mode<synchronous>, transform_indices = @transform_1, window_bounds = array<i64: 32, 16>}, {pipeline_mode = #tpu.pipeline_mode<synchronous>, transform_indices = @transform_2, window_bounds = array<i64: 32, 1>}, {pipeline_mode = #tpu.pipeline_mode<synchronous>, transform_indices = @transform_3, window_bounds = array<i64: 32, 32>}, {pipeline_mode = #tpu.pipeline_mode<synchronous>, transform_indices = @transform_4, window_bounds = array<i64: 32, 1>}, {pipeline_mode = #tpu.pipeline_mode<synchronous>, transform_indices = @transform_5, window_bounds = array<i64: 3, 32>}, {pipeline_mode = #tpu.pipeline_mode<synchronous>, transform_indices = @transform_6, window_bounds = array<i64: 3, 1>}, {transform_indices = @transform_7, window_bounds = array<i64: 3, 256>}]} {
    %c0 = arith.constant 0 : index
    %c0_0 = arith.constant 0 : index
    %0 = vector.load %arg1[%c0, %c0_0] : memref<256x16xf32, #tpu.memory_space<vmem>>, vector<256x16xf32>
    %1 = arith.truncf %0 : vector<256x16xf32> to vector<256x16xbf16>
    %c0_1 = arith.constant 0 : index
    %c0_2 = arith.constant 0 : index
    %2 = vector.load %arg2[%c0_1, %c0_2] : memref<32x16xbf16, #tpu.memory_space<vmem>>, vector<32x16xbf16>
    %cst = arith.constant dense<0.000000e+00> : vector<32x256xf32>
    %3 = tpu.matmul %2, %1, %cst {dimension_numbers = #tpu.dot_dimension_numbers<[1], [1], [0], [0], [0, 0, 1, 0], [], []>} : vector<32x16xbf16>, vector<256x16xbf16>, vector<32x256xf32> -> vector<32x256xf32>
    %c0_3 = arith.constant 0 : index
    %c0_4 = arith.constant 0 : index
    %4 = vector.load %arg3[%c0_3, %c0_4] : memref<32x1xf32, #tpu.memory_space<vmem>>, vector<32x1xf32>
    %5 = vector.broadcast %4 : vector<32x1xf32> to vector<32x256xf32>
    %6 = arith.addf %3, %5 : vector<32x256xf32>
    %7 = arith.truncf %6 : vector<32x256xf32> to vector<32x256xbf16>
    %cst_5 = arith.constant 0.000000e+00 : bf16
    %8 = vector.broadcast %cst_5 : bf16 to vector<32x256xbf16>
    %9 = arith.maximumf %7, %8 : vector<32x256xbf16>
    %c0_6 = arith.constant 0 : index
    %c0_7 = arith.constant 0 : index
    %10 = vector.load %arg4[%c0_6, %c0_7] : memref<32x32xbf16, #tpu.memory_space<vmem>>, vector<32x32xbf16>
    %cst_8 = arith.constant dense<0.000000e+00> : vector<32x256xf32>
    %11 = tpu.matmul %10, %9, %cst_8 {dimension_numbers = #tpu.dot_dimension_numbers<[1], [0], [0], [1], [0, 0, 1, 1], [], []>} : vector<32x32xbf16>, vector<32x256xbf16>, vector<32x256xf32> -> vector<32x256xf32>
    %c0_9 = arith.constant 0 : index
    %c0_10 = arith.constant 0 : index
    %12 = vector.load %arg5[%c0_9, %c0_10] : memref<32x1xf32, #tpu.memory_space<vmem>>, vector<32x1xf32>
    %13 = vector.broadcast %12 : vector<32x1xf32> to vector<32x256xf32>
    %14 = arith.addf %11, %13 : vector<32x256xf32>
    %15 = arith.truncf %14 : vector<32x256xf32> to vector<32x256xbf16>
    %cst_11 = arith.constant 0.000000e+00 : bf16
    %16 = vector.broadcast %cst_11 : bf16 to vector<32x256xbf16>
    %17 = arith.maximumf %15, %16 : vector<32x256xbf16>
    %c0_12 = arith.constant 0 : index
    %c0_13 = arith.constant 0 : index
    %18 = vector.load %arg6[%c0_12, %c0_13] : memref<3x32xbf16, #tpu.memory_space<vmem>>, vector<3x32xbf16>
    %cst_14 = arith.constant dense<0.000000e+00> : vector<3x256xf32>
    %19 = tpu.matmul %18, %17, %cst_14 {dimension_numbers = #tpu.dot_dimension_numbers<[1], [0], [0], [1], [0, 0, 1, 1], [], []>} : vector<3x32xbf16>, vector<32x256xbf16>, vector<3x256xf32> -> vector<3x256xf32>
    %c0_15 = arith.constant 0 : index
    %c0_16 = arith.constant 0 : index
    %20 = vector.load %arg7[%c0_15, %c0_16] : memref<3x1xf32, #tpu.memory_space<vmem>>, vector<3x1xf32>
    %21 = vector.broadcast %20 : vector<3x1xf32> to vector<3x256xf32>
    %22 = arith.addf %19, %21 : vector<3x256xf32>
    %c0_17 = arith.constant 0 : index
    %c0_18 = arith.constant 0 : index
    %23 = vector.load %arg8[%c0_17, %c0_18] : memref<3x256xf32, #tpu.memory_space<vmem>>, vector<3x256xf32>
    tpu.vector_store %arg8[%c0_17, %c0_18], %22 {strides = array<i32>} : memref<3x256xf32, #tpu.memory_space<vmem>>, vector<3x256xf32>,
    return
  }
  func.func @transform_0(%arg0: i32) -> (i32, i32) {
    %c0_i32 = arith.constant 0 : i32
    %c0_i32_0 = arith.constant 0 : i32
    return %arg0, %c0_i32 : i32, i32
  }
  func.func @transform_1(%arg0: i32) -> (i32, i32) {
    %c0_i32 = arith.constant 0 : i32
    %c0_i32_0 = arith.constant 0 : i32
    %c0_i32_1 = arith.constant 0 : i32
    return %c0_i32, %c0_i32_0 : i32, i32
  }
  func.func @transform_2(%arg0: i32) -> (i32, i32) {
    %c0_i32 = arith.constant 0 : i32
    %c0_i32_0 = arith.constant 0 : i32
    %c0_i32_1 = arith.constant 0 : i32
    return %c0_i32, %c0_i32_0 : i32, i32
  }
  func.func @transform_3(%arg0: i32) -> (i32, i32) {
    %c0_i32 = arith.constant 0 : i32
    %c0_i32_0 = arith.constant 0 : i32
    %c0_i32_1 = arith.constant 0 : i32
    return %c0_i32, %c0_i32_0 : i32, i32
  }
  func.func @transform_4(%arg0: i32) -> (i32, i32) {
    %c0_i32 = arith.constant 0 : i32
    %c0_i32_0 = arith.constant 0 : i32
    %c0_i32_1 = arith.constant 0 : i32
    return %c0_i32, %c0_i32_0 : i32, i32
  }
  func.func @transform_5(%arg0: i32) -> (i32, i32) {
    %c0_i32 = arith.constant 0 : i32
    %c0_i32_0 = arith.constant 0 : i32
    %c0_i32_1 = arith.constant 0 : i32
    return %c0_i32, %c0_i32_0 : i32, i32
  }
  func.func @transform_6(%arg0: i32) -> (i32, i32) {
    %c0_i32 = arith.constant 0 : i32
    %c0_i32_0 = arith.constant 0 : i32
    %c0_i32_1 = arith.constant 0 : i32
    return %c0_i32, %c0_i32_0 : i32, i32
  }
  func.func @transform_7(%arg0: i32) -> (i32, i32) {
    %c0_i32 = arith.constant 0 : i32
    %c0_i32_0 = arith.constant 0 : i32
    return %c0_i32, %arg0 : i32, i32
  }
}

</mosaic_0001>

<bundles_post_ra>
// kernel: tpu_custom_call.1
= control target key start
LH: loop header
LB: loop body
LE: loop exit
PB: predicated region body
PF: predicated region fallthrough
CT: control target
= control target key end

     0   :  { %12 = vsyncpa [#allocation3], 0  ;;  %s1087_s0 = inlined_call_operand.vmem [shape: f32[512,16], index: 0, kind: input, shape index: {}]   ;;  %s1088_s1 = inlined_call_operand.vmem [shape: bf16[32,16], index: 1, kind: input, shape index: {}]   ;;  %s1089_s2 = inlined_call_operand.vmem [shape: f32[32,1], index: 2, kind: input, shape index: {}]   ;;  %s1090_s3 = inlined_call_operand.vmem [shape: bf16[32,32], index: 3, kind: input, shape index: {}]   ;;  %s1091_s4 = inlined_call_operand.vmem [shape: f32[32,1], index: 4, kind: input, shape index: {}]   ;;  %s1092_s5 = inlined_call_operand.vmem [shape: bf16[3,32], index: 5, kind: input, shape index: {}]   ;;  %s1093_s6 = inlined_call_operand.vmem [shape: f32[3,1], index: 6, kind: input, shape index: {}]   ;;  %s1094_s7 = inlined_call_operand.hbm [shape: f32[3,512], index: 7, kind: output, shape index: {}]  }
   0x1   :  { %14 = vsyncpa [#allocation3 + $0x1], 0  ;;  %s901_s24 = smov 0   ;;  %s903_s25 = smov 0  }
   0x2   :  { %s905_s26 = smov 0   ;;  %s907_s27 = smov 0  }
   0x3 LB: > { %s922_s28 = sadd.s32 4294967295, %s858_s27   ;;  %s710_s29 = sadd.s32 4294967294, %s858_s27   ;;  %s858_s27 = sphi %s907_s27, %s1100_s27   ;;  %s854_s26 = sphi %s905_s26, %s1099_s26   ;;  %s850_s25 = sphi %s903_s25, %s1098_s25   ;;  %s846_s24 = sphi %s901_s24, %s1097_s24  }
   0x4   : > { %s926_s30 = sadd.s32 1, %s858_s27   ;;  %s179_s8 = sadd.s32 1, %s854_s26 }
   0x5   : > { %s176_s9 = ssub.s32 %s858_s27, %s926_s30  ;;  %p189_p0 = scmp.ne.s32.totalorder %s854_s26, %s850_s25 }
   0x6   : > { %p177_p1 = scmp.eq.s32.totalorder %s176_s9, 0  ;;  %p190_p2 = scmp.eq.s32.totalorder %s922_s28, 1 }
   0x7   : > { %p195_p3 = scmp.ne.s32.totalorder %s850_s25, %s846_s24  ;;  %p196_p4 = scmp.eq.s32.totalorder %s710_s29, 1 }
   0x8   : > { %s937_s10 = scalar_select %p177_p1, %s854_s26, %s179_s8  }
   0x9   : > { %p939_p5 = por %p190_p2, %p189_p0  ;;  %p943_p6 = por %p196_p4, %p195_p3 }
   0xa   : > { %p713_p7 = scmp.ge.s32.totalorder %s858_s27, 1  ;;  %p241_p8 = scmp.lt.s32.totalorder %s858_s27, 3 }
   0xc   : > { %p242_p9 = pnand %p713_p7, %p241_p8 }
   0xd   : > { %s715_s13 = sshll.u32 (!%p242_p9), %s922_s28, 5  ;;  %s270_s18 = sand.u32 (!%p242_p9), 1, %s850_s25  }
   0xe   : > { %245 = sbr.rel (%p242_p9) target bundleno = 563 (0x233), region = 48  ;;  %p274_p10 = scmp.lt.s32.totalorder (!%p242_p9), %s715_s13, 63 }
   0xf   : > { %s714_s19 = sshll.u32 (!%p242_p9), %s270_s18, 3  ;;  %s752_s20 = sshll.u32 (!%p242_p9), %s922_s28, 3 }
  0x10   : > { %s646_s23 = scalar_lea.hbm (!%p242_p9), %s1094_s7, %s752_s20  ;;  %s272_s29 = scalar_lea.vmem (!%p242_p9), [#allocation2], %s714_s19 }
  0x11   : > { %s648_s8 = sshll.u32 (!%p242_p9), %s272_s29, 4  ;;  %s650_s9 = sshll.u32 (!%p242_p9), %s646_s23, 4  ;;  %s649_s8 = int_to_ptr.vmem [resolvable:$true] %s648_s8  ;;  %s651_s9 = int_to_ptr.hbm [resolvable:$true] %s650_s9 }
  0x12   : > { %s635_s28 = scalar_lea.sflag (!%p242_p9), [#allocation3], %s270_s18 }
  0x13   : > { %s1102_s13 = smov (!%p274_p10, %s715_s13), 63  ;;  %vm367_vm0 = vcmask 130048   ;;  %v335_v44 = vld [vmem:[%s1089_s2 + $0x10] sm:$0xff]  ;;  %v333_v45 = vld [vmem:[%s1089_s2] sm:$0xff]  ;;  %v860_v47 = vmov 0   ;;  %v336_v63 = vld [vmem:[%s1089_s2 + $0x18] sm:$0xff] }
  0x14   : > { %s716_s14 = sshll.u32 %s1102_s13, 3  ;;  %794 = vset.pattern.permute.xlu1 %v860_v47  ;;  %793 = vset.pattern.permute.xlu0 %v860_v47  ;;  %vm522_vm1 = vcmask 261120   ;;  %vm630_vm2 = vcmask 1043456   ;;  %s810_s13 = sshra.s32 %s651_s9, 4  ;;  %s811_s13 = int_to_ptr.hbm [resolvable:$true] %s810_s13 }
  0x15   : > { %s953_s17 = scalar_lea.vmem %s1087_s0, %s716_s14  ;;  %339 = vperm.xlu1 %794, %v333_v45   ;;  %349 = vperm.xlu0 %793, %v335_v44   ;;  %v592_v44 = vld [vmem:[%s1093_s6] sm:$0x7]  ;;  %v751_v45 = vld [vmem:[%s1090_s3 + $0x8] sm:$0xff]  ;;  %s812_s14 = scalar_lea.hbm %s811_s13, 8 }
  0x16   : > { %v295_v0 = vld [vmem:[%s953_s17 + $0x70] sm:$0xff]  ;;  %v296_v1 = vld [vmem:[%s953_s17 + $0x78] sm:$0xff]  ;;  %v293_v6 = vld [vmem:[%s953_s17 + $0x60] sm:$0xff]  ;;  %795 = vset.pattern.permute.xlu2 %v860_v47  ;;  %p813_p11 = scmp.ne.s32.totalorder %s811_s13, %s812_s14  ;;  %p817_p0 = scmp.lt.s32.totalorder %s811_s13, %s1094_s7 }
  0x17   : > { %v311_v2 = vld [vmem:[%s953_s17 + $0xf0] sm:$0xff]  ;;  %v320_v3 = vpack.c.bf16 %v296_v1, %v295_v0  ;;  %v312_v4 = vld [vmem:[%s953_s17 + $0xf8] sm:$0xff]  ;;  %v294_v7 = vld [vmem:[%s953_s17 + $0x68] sm:$0xff] }
  0x18   : > { %v328_v5 = vpack.c.bf16 %v312_v4, %v311_v2  ;;  %v309_v9 = vld [vmem:[%s953_s17 + $0xe0] sm:$0xff]  ;;  %v310_v10 = vld [vmem:[%s953_s17 + $0xe8] sm:$0xff]  ;;  %v319_v12 = vpack.c.bf16 %v294_v7, %v293_v6  ;;  %v291_v16 = vld [vmem:[%s953_s17 + $0x50] sm:$0xff]  ;;  %p814_p12 = pnand %p813_p11, %p939_p5 }
  0x19   : > { %v396_v8 = vsel %vm367_vm0, %v320_v3, 0  ;;  %v327_v13 = vpack.c.bf16 %v310_v10, %v309_v9  ;;  %v292_v17 = vld [vmem:[%s953_s17 + $0x58] sm:$0xff]  ;;  %v307_v18 = vld [vmem:[%s953_s17 + $0xd0] sm:$0xff]  ;;  %v289_v24 = vld [vmem:[%s953_s17 + $0x40] sm:$0xff] }
  0x1a   : > { %422 = vmatpush.bf16.xpose.msra.mxu0 %v396_v8  ;;  %v420_v11 = vsel %vm367_vm0, %v328_v5, 0  ;;  %v393_v14 = vsel %vm367_vm0, %v319_v12, 0  ;;  %v308_v19 = vld [vmem:[%s953_s17 + $0xd8] sm:$0xff]  ;;  %v318_v20 = vpack.c.bf16 %v292_v17, %v291_v16  ;;  %v290_v25 = vld [vmem:[%s953_s17 + $0x48] sm:$0xff]  ;;  %v305_v26 = vld [vmem:[%s953_s17 + $0xc0] sm:$0xff]  ;;  %p815_p13 = pneg %p814_p12 }
  0x1b   : > { %441 = vmatpush.bf16.xpose.msra.mxu1 %v420_v11  ;;  %v417_v15 = vsel %vm367_vm0, %v327_v13, 0  ;;  %v326_v21 = vpack.c.bf16 %v308_v19, %v307_v18  ;;  %v306_v27 = vld [vmem:[%s953_s17 + $0xc8] sm:$0xff]  ;;  %v317_v28 = vpack.c.bf16 %v290_v25, %v289_v24  ;;  %v287_v32 = vld [vmem:[%s953_s17 + $0x30] sm:$0xff]  ;;  %v288_v33 = vld [vmem:[%s953_s17 + $0x38] sm:$0xff] }
  0x1c   : > { %v390_v22 = vsel %vm367_vm0, %v318_v20, 0  ;;  %v325_v29 = vpack.c.bf16 %v306_v27, %v305_v26  ;;  %v303_v34 = vld [vmem:[%s953_s17 + $0xb0] sm:$0xff]  ;;  %v304_v35 = vld [vmem:[%s953_s17 + $0xb8] sm:$0xff]  ;;  %v316_v36 = vpack.c.bf16 %v288_v33, %v287_v32  ;;  %v285_v40 = vld [vmem:[%s953_s17 + $0x20] sm:$0xff] }
  0x1d   : > { %v414_v23 = vsel %vm367_vm0, %v326_v21, 0  ;;  %v387_v30 = vsel %vm367_vm0, %v317_v28, 0  ;;  %v324_v37 = vpack.c.bf16 %v304_v35, %v303_v34  ;;  %v286_v41 = vld [vmem:[%s953_s17 + $0x28] sm:$0xff]  ;;  %v301_v42 = vld [vmem:[%s953_s17 + $0xa0] sm:$0xff]  ;;  %v283_v51 = vld [vmem:[%s953_s17 + $0x10] sm:$0xff]  ;;  %354 = vperm.xlu0 %793, %v336_v63  }
  0x1e   : > { %v411_v31 = vsel %vm367_vm0, %v325_v29, 0  ;;  %v384_v38 = vsel %vm367_vm0, %v316_v36, 0  ;;  %v302_v43 = vld [vmem:[%s953_s17 + $0xa8] sm:$0xff]  ;;  %v315_v46 = vpack.c.bf16 %v286_v41, %v285_v40  ;;  %v284_v52 = vld [vmem:[%s953_s17 + $0x18] sm:$0xff]  ;;  %v299_v53 = vld [vmem:[%s953_s17 + $0x90] sm:$0xff] }
  0x1f   : > { %v408_v39 = vsel %vm367_vm0, %v324_v37, 0  ;;  %v323_v48 = vpack.c.bf16 %v302_v43, %v301_v42  ;;  %v300_v54 = vld [vmem:[%s953_s17 + $0x98] sm:$0xff]  ;;  %v314_v55 = vpack.c.bf16 %v284_v52, %v283_v51  ;;  %v281_v59 = vld [vmem:[%s953_s17] sm:$0xff]  ;;  %v282_v60 = vld [vmem:[%s953_s17 + $0x8] sm:$0xff] }
  0x20   : > { %v381_v49 = vsel %vm367_vm0, %v315_v46, 0  ;;  %v322_v56 = vpack.c.bf16 %v300_v54, %v299_v53  ;;  %v297_v61 = vld [vmem:[%s953_s17 + $0x80] sm:$0xff]  ;;  %v298_v62 = vld [vmem:[%s953_s17 + $0x88] sm:$0xff]  ;;  %v313_v1 = vpack.c.bf16 %v282_v60, %v281_v59  ;;  %v490_v19 = vld [vmem:[%s1091_s4 + $0x10] sm:$0xff]  ;;  %s816_s17 = scalar_lea.hbm %s1094_s7, 16 }
  0x21   : > { %v405_v50 = vsel %vm367_vm0, %v323_v48, 0  ;;  %v378_v57 = vsel %vm367_vm0, %v314_v55, 0  ;;  %v334_v0 = vld [vmem:[%s1089_s2 + $0x8] sm:$0xff]  ;;  %v321_v2 = vpack.c.bf16 %v298_v62, %v297_v61  ;;  %v488_v5 = vld [vmem:[%s1091_s4] sm:$0xff]  ;;  %504 = vperm.xlu2 %795, %v490_v19   ;;  %v491_v36 = vld [vmem:[%s1091_s4 + $0x18] sm:$0xff]  ;;  %p818_p1 = scmp.lt.s32.totalorder %s816_s17, %s812_s14 }
  0x22   : > { %423 = vmatpush.bf16.xpose.msra.mxu0 %v393_v14  ;;  %v402_v58 = vsel %vm367_vm0, %v322_v56, 0  ;;  %344 = vperm.xlu1 %794, %v334_v0   ;;  %v375_v3 = vsel %vm367_vm0, %v313_v1, 0  ;;  %v489_v6 = vld [vmem:[%s1091_s4 + $0x8] sm:$0xff]  ;;  %v748_v7 = vld [vmem:[%s1088_s1] sm:$0xff] }
  0x23   : > { %442 = vmatpush.bf16.xpose.msra.mxu1 %v417_v15  ;;  %v399_v4 = vsel %vm367_vm0, %v321_v2, 0  ;;  %v749_v8 = vld [vmem:[%s1088_s1 + $0x8] sm:$0xff]  ;;  %v750_v43 = vld [vmem:[%s1090_s3] sm:$0xff]  ;;  %p819_p2 = por %p818_p1, %p817_p0 }
  0x25   : > { %494 = vperm.xlu0 %793, %v488_v5   ;;  %p820_p3 = pnand %p819_p2, %p815_p13 }
  0x29   : > { %509 = vperm.xlu2 %795, %v491_v36  }
  0x2a   : > { %424 = vmatpush.bf16.xpose.msra.mxu0 %v390_v22  ;;  %499 = vperm.xlu1 %794, %v489_v6  }
  0x2b   : > { %443 = vmatpush.bf16.xpose.msra.mxu1 %v414_v23 }
  0x31   : > { %595 = vperm.xlu2 %795, %v592_v44  }
  0x32   : > { %425 = vmatpush.bf16.xpose.msra.mxu0 %v387_v30 }
  0x33   : > { %444 = vmatpush.bf16.xpose.msra.mxu1 %v411_v31 }
  0x3a   : > { %426 = vmatpush.bf16.xpose.msra.mxu0 %v384_v38 }
  0x3b   : > { %445 = vmatpush.bf16.xpose.msra.mxu1 %v408_v39 }
  0x42   : > { %427 = vmatpush.bf16.xpose.msra.mxu0 %v381_v49 }
  0x43   : > { %446 = vmatpush.bf16.xpose.msra.mxu1 %v405_v50 }
  0x4a   : > { %428 = vmatpush.bf16.xpose.msra.mxu0 %v378_v57 }
  0x4b   : > { %447 = vmatpush.bf16.xpose.msra.mxu1 %v402_v58 }
  0x52   : > { %429 = vmatpush.bf16.xpose.msra.mxu0 %v375_v3 }
  0x53   : > { %448 = vmatpush.bf16.xpose.msra.mxu1 %v399_v4 }
  0x59   : > { %725 = vmatmul.msk.bf16.vlgmr.msra.gmra.mxu0 %vm367_vm0, %v748_v7 }
  0x5a   : > { %727 = vmatmul.msk.bf16.vlgmr.msra.gmra.mxu1 %vm367_vm0, %v748_v7 }
  0x69   : > { %726 = vmatmul.msk.bf16.gmra.mxu0 %vm367_vm0, %v749_v8 }
  0x6a   : > { %728 = vmatmul.msk.bf16.gmra.mxu1 %vm367_vm0, %v749_v8 }
  0x7b   : > { %v505_v50 = vpop.permute.xlu2 %504 }
  0x83   : > { %v510_v55 = vpop.permute.xlu2 %509 }
  0x87   : > { %v340_v13 = vpop.permute.xlu1 %339  ;;  %v350_v14 = vpop.permute.xlu0 %349 }
  0x8f   : > { %v355_v20 = vpop.permute.xlu0 %354 }
  0x94   : > { %v345_v17 = vpop.permute.xlu1 %344 }
  0x97   : > { %v495_v61 = vpop.permute.xlu0 %494 }
  0x9c   : > { %v500_v53 = vpop.permute.xlu1 %499 }
  0xd6   : > { %v431_v9 = vpop.f32.mrf.mxu0 }
  0xd7   : > { %v450_v10 = vpop.f32.mrf.mxu1  ;;  %v432_v28 = vadd.f32 %v431_v9, %v340_v13 }
  0xd8   : > { %v451_v31 = vadd.f32 %v450_v10, %v340_v13 }
  0xd9   : > { %v472_v39 = vmax.f32 %v432_v28, 0.0 }
  0xda   : > { %v473_v40 = vmax.f32 %v451_v31, 0.0 }
  0xde   : > { %v433_v11 = vpop.f32.mrf.mxu0 }
  0xdf   : > { %v452_v12 = vpop.f32.mrf.mxu1  ;;  %v434_v23 = vadd.f32 %v433_v11, %v345_v17 }
  0xe0   : > { %v453_v26 = vadd.f32 %v452_v12, %v345_v17 }
  0xe1   : > { %v474_v34 = vmax.f32 %v434_v23, 0.0 }
  0xe2   : > { %v475_v37 = vmax.f32 %v453_v26, 0.0 }
  0xe3   : > { %v480_v41 = vpack.c.bf16 %v474_v34, %v472_v39 }
  0xe4   : > { %v481_v42 = vpack.c.bf16 %v475_v37, %v473_v40 }
  0xe6   : > { %v436_v15 = vpop.f32.mrf.mxu0 }
  0xe7   : > { %v455_v16 = vpop.f32.mrf.mxu1  ;;  %v437_v18 = vadd.f32 %v436_v15, %v350_v14 }
  0xe8   : > { %v456_v21 = vadd.f32 %v455_v16, %v350_v14  ;;  %v591_v14 = vld [vmem:[%s1092_s5] sm:$0x3]  ;;  %v596_v16 = vpop.permute.xlu2 %595 }
  0xe9   : > { %v476_v29 = vmax.f32 %v437_v18, 0.0 }
  0xea   : > { %v477_v32 = vmax.f32 %v456_v21, 0.0 }
  0xee   : > { %v438_v22 = vpop.f32.mrf.mxu0 }
  0xef   : > { %v439_v24 = vadd.f32 %v438_v22, %v355_v20  ;;  %v457_v25 = vpop.f32.mrf.mxu1 }
  0xf0   : > { %v458_v27 = vadd.f32 %v457_v25, %v355_v20 }
  0xf1   : > { %v478_v30 = vmax.f32 %v439_v24, 0.0 }
  0xf2   : > { %v479_v33 = vmax.f32 %v458_v27, 0.0 }
  0xf3   : > { %v482_v35 = vpack.c.bf16 %v478_v30, %v476_v29 }
  0xf4   : > { %v483_v38 = vpack.c.bf16 %v479_v33, %v477_v32 }
  0xf5   : > { %535 = vmatpush.bf16.msra.mxu2 %v482_v35 }
  0xf6   : > { %554 = vmatpush.bf16.msra.mxu3 %v483_v38 }
  0xf9   : > { %536 = vmatpush.bf16.msra.mxu2 %v480_v41 }
  0xfa   : > { %555 = vmatpush.bf16.msra.mxu3 %v481_v42 }
  0xfc   : > { %737 = vmatmul.msk.bf16.vlgmr.msra.gmra.mxu2 %vm522_vm1, %v750_v43 }
  0xfd   : > { %739 = vmatmul.msk.bf16.vlgmr.msra.gmra.mxu3 %vm522_vm1, %v750_v43 }
 0x10c   : > { %738 = vmatmul.msk.bf16.gmra.mxu2 %vm522_vm1, %v751_v45 }
 0x10d   : > { %740 = vmatmul.msk.bf16.gmra.mxu3 %vm522_vm1, %v751_v45 }
 0x17f   : > { %v538_v46 = vpop.f32.mrf.mxu2 }
 0x180   : > { %v557_v47 = vpop.f32.mrf.mxu3  ;;  %v539_v0 = vadd.f32 %v538_v46, %v495_v61 }
 0x181   : > { %v558_v3 = vadd.f32 %v557_v47, %v495_v61 }
 0x182   : > { %v579_v10 = vmax.f32 %v539_v0, 0.0 }
 0x183   : > { %v580_v11 = vmax.f32 %v558_v3, 0.0 }
 0x187   : > { %v540_v48 = vpop.f32.mrf.mxu2 }
 0x188   : > { %v559_v49 = vpop.f32.mrf.mxu3  ;;  %v541_v58 = vadd.f32 %v540_v48, %v500_v53 }
 0x189   : > { %v560_v62 = vadd.f32 %v559_v49, %v500_v53 }
 0x18a   : > { %v581_v6 = vmax.f32 %v541_v58, 0.0 }
 0x18b   : > { %v582_v8 = vmax.f32 %v560_v62, 0.0 }
 0x18c   : > { %v587_v12 = vpack.c.bf16 %v581_v6, %v579_v10 }
 0x18d   : > { %v588_v13 = vpack.c.bf16 %v582_v8, %v580_v11 }
 0x18f   : > { %v543_v51 = vpop.f32.mrf.mxu2 }
 0x190   : > { %v562_v52 = vpop.f32.mrf.mxu3  ;;  %v544_v54 = vadd.f32 %v543_v51, %v505_v50 }
 0x191   : > { %v563_v56 = vadd.f32 %v562_v52, %v505_v50 }
 0x192   : > { %v583_v1 = vmax.f32 %v544_v54, 0.0 }
 0x193   : > { %v584_v4 = vmax.f32 %v563_v56, 0.0 }
 0x197   : > { %v545_v57 = vpop.f32.mrf.mxu2 }
 0x198   : > { %v546_v59 = vadd.f32 %v545_v57, %v510_v55  ;;  %v564_v60 = vpop.f32.mrf.mxu3 }
 0x199   : > { %v565_v63 = vadd.f32 %v564_v60, %v510_v55 }
 0x19a   : > { %v585_v2 = vmax.f32 %v546_v59, 0.0 }
 0x19b   : > { %v586_v5 = vmax.f32 %v565_v63, 0.0 }
 0x19c   : > { %v589_v7 = vpack.c.bf16 %v585_v2, %v583_v1 }
 0x19d   : > { %v590_v9 = vpack.c.bf16 %v586_v5, %v584_v4 }
 0x19e   : > { %607 = vmatpush.bf16.msrb.mxu2 %v589_v7 }
 0x19f   : > { %620 = vmatpush.bf16.msrb.mxu3 %v590_v9 }
 0x1a2   : > { %608 = vmatpush.bf16.msrb.mxu2 %v587_v12 }
 0x1a3   : > { %621 = vmatpush.bf16.msrb.mxu3 %v588_v13 }
 0x1a5   : > { %741 = vmatmul.msk.bf16.vlgmr.msrb.gmra.mxu2 %vm522_vm1, %v591_v14 }
 0x1a6   : > { %742 = vmatmul.msk.bf16.vlgmr.msrb.gmra.mxu3 %vm522_vm1, %v591_v14 }
 0x228   : > { %v610_v15 = vpop.f32.mrf.mxu2 }
 0x229   : > { %v623_v17 = vpop.f32.mrf.mxu3  ;;  %v611_v19 = vadd.f32 %v610_v15, %v596_v16 }
 0x22a   : > { %v624_v18 = vadd.f32 %v623_v17, %v596_v16 }
 0x22c   : > { %v629_v20 = vrot.slane %v624_v18, 4 }
 0x22e   : > { %v631_v21 = vsel %vm630_vm2, %v611_v19, %v629_v20 }
 0x22f   : > { %633 = vst [vmem:[%s272_s29] sm:$0x77] %v631_v21 }
 0x230   : > { %v612_v22 = vpop.f32.mrf.mxu2 }
 0x231   : > { %823 = shalt.err (!%p820_p3)
}
 0x232   : > { %753 = dma.vmem_to_hbm [thread:$0]  (%p939_p5), %s649_s8, 128, %s651_s9, %s635_s28   ;;  %v625_v23 = vpop.f32.mrf.mxu3 }
 0x233 PF: > { %p759_p4 = scmp.ge.s32.totalorder %s858_s27, 2  ;;  %s662_s18 = sand.u32 1, %s846_s24  }
 0x234   : > { %s663_s21 = scalar_lea.sflag [#allocation3], %s662_s18 }
 0x235   : > { %p756_p7 = pnand %p759_p4, %p943_p6 }
 0x237   : > { %p757_p8 = pneg %p756_p7 }
 0x239   : > { %841 = dma.done.wait (%p757_p8), %s663_s21, 128  }
 0x23a   : > { %843 = vsyncadd (%p757_p8), %s663_s21, 4294967168  ;;  %p17_p9 = scmp.ge.s32.totalorder %s926_s30, 4   ;;  %s1097_s24 = smov %s850_s25 }
 0x23b   : > { %s1098_s25 = smov %s854_s26  ;;  %s1099_s26 = smov %s937_s10 }
 0x23c   : > { %s1100_s27 = smov %s926_s30  ;;  %19 = sbr.rel (!%p17_p9) target bundleno = 3 (0x3), region = 83 }
 0x241   :  { %669 = vsyncpa [#allocation3], 1 }
 0x242   :  { %671 = vsyncpa [#allocation3 + $0x1], 1 }

</bundles_post_ra>
